<compile_context>
chip_gen: v7x
topology: tpu7x:2x2x1
jax: 0.10.0
libtpu: 0.0.40
codegen_flags: <defaults>
</compile_context>

<pallas_src>
import jax
import jax.numpy as jnp
from jax.experimental import pallas as pl
from jax.experimental.pallas import tpu as pltpu


def predictable_tensor(shape, dtype=jnp.float32):
    """Matches torch predictable_tensor: values 1..N reshaped to `shape`."""
    count = 1
    for s in shape:
        count *= s
    return jnp.arange(1, 1 + count, dtype=dtype).reshape(shape)


def _round_up(n, m):
    return ((n + m - 1) // m) * m


def _fused_affine_kernel(xt_ref, wt_ref, b_ref, ot_ref):
    # xt_ref: (d_in, TB) batch-on-lanes tile; wt_ref: (d_out, d_in) fused
    # weight; b_ref: (d_out, 1).  One MXU matmul + one lane-broadcast bias add.
    ot_ref[...] = (
        jnp.dot(wt_ref[...], xt_ref[...], preferred_element_type=jnp.float32)
        + b_ref[...]
    ).astype(ot_ref.dtype)


def mlp_forward(x, w1, b1, w2, b2, w3, b3):
    """y = fc3(fc2(fc1(x))) with PyTorch Linear convention W[out, in]."""
    B, d_in = x.shape
    d_out = w3.shape[0]

    # --- Algebraic fusion (no activations => one affine map) ----------------
    # y = x @ (W1.T @ W2.T @ W3.T) + ((b1 @ W2.T + b2) @ W3.T + b3)
    w_eff = w1.T @ w2.T @ w3.T                   # (d_in, d_out) = (5, 2)
    b_eff = (b1 @ w2.T + b2) @ w3.T + b3         # (d_out,)
    w_eff_t = w_eff.T                            # (d_out, d_in) = (2, 5)
    b_col = b_eff.reshape(d_out, 1)              # (2, 1): lane-broadcast bias

    # --- Batch-on-lanes tiling ----------------------------------------------
    # TB must be a multiple of 128 (lane width) so every load/store is
    # unmasked and DMAs are contiguous.  Big cap amortizes per-step overhead;
    # when batch allows, keep >=2 grid steps so v7x's two TCs both get work.
    pad128 = max(_round_up(B, 128), 128)
    TB_CAP = 8192
    if pad128 <= 128:
        TB = pad128
    else:
        TB = max(128, min(TB_CAP, ((pad128 // 2) // 128) * 128))
    padded_B = _round_up(B, TB)

    xt = x.T                                     # (d_in, B), batch on lanes
    if padded_B != B:
        xt = jnp.pad(xt, ((0, 0), (0, padded_B - B)))
    grid = (padded_B // TB,)

    rep2d = lambda a: pl.BlockSpec(a.shape, lambda i: (0, 0))  # replicated

    out_t = pl.pallas_call(
        _fused_affine_kernel,
        out_shape=jax.ShapeDtypeStruct((d_out, padded_B), x.dtype),
        grid_spec=pltpu.PrefetchScalarGridSpec(
            num_scalar_prefetch=0,
            grid=grid,
            in_specs=[
                pl.BlockSpec((d_in, TB), lambda i: (0, i)),  # x.T batch-tiled
                rep2d(w_eff_t),
                rep2d(b_col),
            ],
            out_specs=pl.BlockSpec((d_out, TB), lambda i: (0, i)),
        ),
        compiler_params=pltpu.CompilerParams(
            dimension_semantics=("parallel",)),
    )(xt, w_eff_t, b_col)

    # Back to (B, d_out); padded columns hold only b_eff and are sliced off.
    return out_t.T[:B]


if __name__ == "__main__":
    # Deterministic parameters, identical to the PyTorch module's init:
    # fc1: Linear(5, 5), fc2: Linear(5, 10), fc3: Linear(10, 2)
    w1 = predictable_tensor((5, 5))
    b1 = predictable_tensor((5,))
    w2 = predictable_tensor((10, 5))
    b2 = predictable_tensor((10,))
    w3 = predictable_tensor((2, 10))
    b3 = predictable_tensor((2,))

    key = jax.random.PRNGKey(0)

    # Small deterministic input: batch=8, in_features=5.
    x = jax.random.normal(key, (8, 5), dtype=jnp.float32)
    out = jax.block_until_ready(mlp_forward(x, w1, b1, w2, b2, w3, b3))

    # Pure-JAX unfused reference (same per-layer math as the torch forward).
    ref = ((x @ w1.T + b1) @ w2.T + b2) @ w3.T + b3
    assert out.shape == (8, 2), out.shape
    # Fused vs. unfused f32 differ only by rounding at ~1e5-1e6 magnitudes.
    assert jnp.allclose(out, ref, rtol=1e-4, atol=1e-2), (out, ref)

    # Also exercise the multi-step grid + padding path (B not a multiple of 128).
    x2 = jax.random.normal(jax.random.PRNGKey(1), (300, 5), dtype=jnp.float32)
    out2 = jax.block_until_ready(mlp_forward(x2, w1, b1, w2, b2, w3, b3))
    ref2 = ((x2 @ w1.T + b1) @ w2.T + b2) @ w3.T + b3
    assert out2.shape == (300, 2), out2.shape
    assert jnp.allclose(out2, ref2, rtol=1e-4, atol=1e-2)

    print("KERNEL_OK")
</pallas_src>

<mosaic_0001>
module attributes {stable_mosaic.version = 11 : i64} {
  func.func @_fused_affine_kernel(%arg0: i32, %arg1: memref<5x128xf32, #tpu.memory_space<vmem>>, %arg2: memref<2x5xf32, #tpu.memory_space<vmem>>, %arg3: memref<2x1xf32, #tpu.memory_space<vmem>>, %arg4: memref<2x128xf32, #tpu.memory_space<vmem>>) attributes {dimension_semantics = [#tpu.dimension_semantics<parallel>], iteration_bounds = array<i64: 1>, scalar_prefetch = 0 : i64, scratch_operands = 0 : i64, tpu.core_type = #tpu.core_type<tc>, window_params = [{transform_indices = @transform_0, window_bounds = array<i64: 5, 128>}, {pipeline_mode = #tpu.pipeline_mode<synchronous>, transform_indices = @transform_1, window_bounds = array<i64: 2, 5>}, {pipeline_mode = #tpu.pipeline_mode<synchronous>, transform_indices = @transform_2, window_bounds = array<i64: 2, 1>}, {transform_indices = @transform_3, window_bounds = array<i64: 2, 128>}]} {
    %c0 = arith.constant 0 : index
    %c0_0 = arith.constant 0 : index
    %0 = vector.load %arg2[%c0, %c0_0] : memref<2x5xf32, #tpu.memory_space<vmem>>, vector<2x5xf32>
    %c0_1 = arith.constant 0 : index
    %c0_2 = arith.constant 0 : index
    %1 = vector.load %arg1[%c0_1, %c0_2] : memref<5x128xf32, #tpu.memory_space<vmem>>, vector<5x128xf32>
    %cst = arith.constant dense<0.000000e+00> : vector<2x128xf32>
    %2 = tpu.matmul %0, %1, %cst {dimension_numbers = #tpu.dot_dimension_numbers<[1], [0], [0], [1], [0, 0, 1, 1], [], []>} : vector<2x5xf32>, vector<5x128xf32>, vector<2x128xf32> -> vector<2x128xf32>
    %c0_3 = arith.constant 0 : index
    %c0_4 = arith.constant 0 : index
    %3 = vector.load %arg3[%c0_3, %c0_4] : memref<2x1xf32, #tpu.memory_space<vmem>>, vector<2x1xf32>
    %4 = vector.broadcast %3 : vector<2x1xf32> to vector<2x128xf32>
    %5 = arith.addf %2, %4 : vector<2x128xf32>
    %c0_5 = arith.constant 0 : index
    %c0_6 = arith.constant 0 : index
    %6 = vector.load %arg4[%c0_5, %c0_6] : memref<2x128xf32, #tpu.memory_space<vmem>>, vector<2x128xf32>
    tpu.vector_store %arg4[%c0_5, %c0_6], %5 {strides = array<i32>} : memref<2x128xf32, #tpu.memory_space<vmem>>, vector<2x128xf32>,
    return
  }
  func.func @transform_0(%arg0: i32) -> (i32, i32) {
    %c0_i32 = arith.constant 0 : i32
    %c0_i32_0 = arith.constant 0 : i32
    return %c0_i32, %arg0 : i32, i32
  }
  func.func @transform_1(%arg0: i32) -> (i32, i32) {
    %c0_i32 = arith.constant 0 : i32
    %c0_i32_0 = arith.constant 0 : i32
    %c0_i32_1 = arith.constant 0 : i32
    return %c0_i32, %c0_i32_0 : i32, i32
  }
  func.func @transform_2(%arg0: i32) -> (i32, i32) {
    %c0_i32 = arith.constant 0 : i32
    %c0_i32_0 = arith.constant 0 : i32
    %c0_i32_1 = arith.constant 0 : i32
    return %c0_i32, %c0_i32_0 : i32, i32
  }
  func.func @transform_3(%arg0: i32) -> (i32, i32) {
    %c0_i32 = arith.constant 0 : i32
    %c0_i32_0 = arith.constant 0 : i32
    return %c0_i32, %arg0 : i32, i32
  }
}

</mosaic_0001>

<bundles_post_ra>
// kernel: tpu_custom_call.1
= control target key start
LH: loop header
LB: loop body
LE: loop exit
PB: predicated region body
PF: predicated region fallthrough
CT: control target
= control target key end

     0   :  { %8 = vsyncpa [#allocation3], 0  ;;  %s247_s0 = inlined_call_operand.hbm [shape: f32[5,128], index: 0, kind: input, shape index: {}]   ;;  %s248_s1 = inlined_call_operand.vmem [shape: f32[2,5], index: 1, kind: input, shape index: {}]   ;;  %s249_s2 = inlined_call_operand.vmem [shape: f32[2,1], index: 2, kind: input, shape index: {}]   ;;  %s250_s3 = inlined_call_operand.hbm [shape: f32[2,128], index: 3, kind: output, shape index: {}]  }
   0x1   :  { %9 = vsyncpa [#allocation4], 0  ;;  %s192_s12 = smov [#allocation2]   ;;  %s144_s16 = scalar_lea.hbm %s247_s0, 128 }
   0x2   :  { %s16_s13 = sshll.u32 %s192_s12, 4  ;;  %p145_p0 = scmp.ne.s32.totalorder %s247_s0, %s144_s16  ;;  %s17_s13 = int_to_ptr.vmem [resolvable:$true] %s16_s13 }
   0x3   :  { %p148_p1 = scmp.lt.u32.totalorder %s144_s16, %s247_s0 }
   0x5   :  { %p150_p2 = pnand %p148_p1, %p145_p0 }
   0x7   :  { %153 = shalt.err (!%p150_p2)
}
   0x8   :  { %s154_s21 = scalar_lea.vmem %s17_s13, 128  ;;  %p159_p4 = scmp.lt.s32.totalorder %s17_s13, %s17_s13 }
   0x9   :  { %p155_p3 = scmp.ne.s32.totalorder %s17_s13, %s154_s21  ;;  %p160_p5 = scmp.lt.s32.totalorder %s154_s21, %s154_s21 }
   0xb   :  { %p161_p6 = por %p160_p5, %p159_p4 }
   0xd   :  { %p162_p7 = pnand %p161_p6, %p155_p3 }
   0xf   :  { %165 = shalt.err (!%p162_p7)
}
  0x10   :  { %19 = dma.hbm_to_vmem [thread:$0]  %s247_s0, 128, %s17_s13, [#allocation3]  }
  0x11   :  { %188 = dma.done.wait [#allocation3], 128  }
  0x12   :  { %189 = vsyncadd [#allocation3], 4294967168  ;;  %v193_v0 = vmov 0.0   ;;  %vm194_vm0 = vmmov 0   ;;  %v195_v1 = vmov 0   ;;  %vm39_vm1 = vcmask 1044480  }
  0x13   :  { %133 = vmatprep.subr.mxu0 %v193_v0  ;;  %135 = vmatprep.mubr.msk.f32.mxu0 %vm194_vm0, %v193_v0  ;;  %vm35_vm2 = vcmask 39936   ;;  %v28_v2 = vld [vmem:[#allocation2] sm:$0x1f]  ;;  %s196_s0 = smov [#allocation5]  }
  0x14   :  { %143 = vset.pattern.permute.xlu0 %v195_v1  ;;  %v27_v3 = vld [vmem:[%s248_s1] sm:$0x3]  ;;  %134 = vmatpush3.msk.msra.mxu0 %vm39_vm1, %v28_v2  ;;  %s120_s28 = sshll.u32 %s196_s0, 4  ;;  %s121_s28 = int_to_ptr.vmem [resolvable:$true] %s120_s28 }
  0x15   :  { %v29_v4 = vld [vmem:[%s249_s2] sm:$0x3]  ;;  %136 = vmatmul.mubr.msk.f32.vlgmr.msra.gmra.mrb[0].mxu0 %vm35_vm2, %v27_v3  ;;  %s166_s29 = scalar_lea.vmem %s121_s28, 32  ;;  %p171_p9 = scmp.lt.s32.totalorder %s121_s28, %s121_s28 }
  0x16   :  { %32 = vperm.xlu0 %143, %v29_v4   ;;  %p167_p8 = scmp.ne.s32.totalorder %s121_s28, %s166_s29  ;;  %p172_p10 = scmp.lt.s32.totalorder %s166_s29, %s166_s29 }
  0x18   :  { %p173_p11 = por %p172_p10, %p171_p9 }
  0x1a   :  { %p174_p12 = pnand %p173_p11, %p167_p8 }
  0x95   :  { %v33_v5 = vpop.permute.xlu0 %32 }
  0xe8   :  { %v109_v6 = vpop.f32.mrb[0].mxu0 }
  0xe9   :  { %v110_v7 = vadd.f32 %v109_v6, %v33_v5  ;;  %v137_v8 = vpop.f32.mrb[1].mxu0 }
  0xeb   :  { %113 = vst [vmem:[#allocation5] sm:$0x3] %v110_v7 }
  0xec   :  { %177 = shalt.err (!%p174_p12)
}
  0xed   :  { %s178_s30 = scalar_lea.hbm %s250_s3, 32 }
  0xee   :  { %p179_p13 = scmp.ne.s32.totalorder %s250_s3, %s178_s30  ;;  %p182_p0 = scmp.lt.u32.totalorder %s178_s30, %s250_s3 }
  0xf0   :  { %p184_p1 = pnand %p182_p0, %p179_p13 }
  0xf2   :  { %187 = shalt.err (!%p184_p1)
}
  0xf3   :  { %123 = dma.vmem_to_hbm [thread:$0]  %s121_s28, 32, %s250_s3, [#allocation4]  }
  0xf4   :  { %190 = dma.done.wait [#allocation4], 32  }
  0xf5   :  { %191 = vsyncadd [#allocation4], 4294967264 }
  0xf6   :  { %127 = vsyncpa [#allocation3], 1 }
  0xf7   :  { %128 = vsyncpa [#allocation4], 1 }

</bundles_post_ra>
